<compile_context>
chip_gen: v7x
topology: tpu7x:2x2x1
jax: 0.10.0
libtpu: 0.0.40
codegen_flags: <defaults>
</compile_context>

<pallas_src>
import functools

import jax
import jax.numpy as jnp
import numpy as np
from jax import lax
from jax.experimental import pallas as pl
from jax.experimental.pallas import tpu as pltpu

_LANES = 128
_SUBLANES = 8
_GROUP_ELEMS = _SUBLANES * _LANES      # 1024 elements = one f32 vreg group
# 4096 x 128 f32 block = 2 MiB; 2 inputs x 2 pipeline buffers = 8 MiB VMEM.
_MAX_BLOCK_ROWS = 4096
_UNROLL = 2                            # 21 carries + ~2x(c,a,d,tmp) << 64 vregs


def _ece_kernel(confs_ref, accs_ref, out_ref, *, bounds, full_groups, tail_groups):
    """One grid step: boundary prefix partial sums for this row block.

    out_ref[0, b] = sum(d where c <= bounds[b]) over this block, kept as a
    per-(sublane, lane) (8, 128) slab; reduction to scalars happens outside.
    """
    nb = len(bounds)

    def accumulate(n_groups):
        def body(g, carry):
            off = pl.multiple_of(g * _SUBLANES, _SUBLANES)
            c = confs_ref[pl.ds(off, _SUBLANES), :].astype(jnp.float32)
            a = accs_ref[pl.ds(off, _SUBLANES), :].astype(jnp.float32)
            d = c - a                  # zero-padded elements give d == 0
            # 1 cmp + 1 select + 1 add per boundary: pure VALU, accumulators
            # stay register-resident across the whole block traversal.
            return tuple(
                carry[b] + jnp.where(c <= jnp.float32(bounds[b]), d, jnp.float32(0.0))
                for b in range(nb)
            )

        init = tuple(jnp.zeros((_SUBLANES, _LANES), jnp.float32) for _ in range(nb))
        carry = lax.fori_loop(0, n_groups, body, init,
                              unroll=min(_UNROLL, n_groups))
        for b in range(nb):
            out_ref[0, b, :, :] = carry[b]

    if tail_groups == full_groups:
        # Every grid block is full: single static path, no branching.
        accumulate(full_groups)
    else:
        i = pl.program_id(0)
        last = pl.num_programs(0) - 1

        @pl.when(i < last)
        def _full_block():
            accumulate(full_groups)

        @pl.when(i == last)
        def _tail_block():
            # Ragged last block: only the first `tail_groups` vreg groups hold
            # valid rows; rows past the array end are never read.
            accumulate(tail_groups)


@functools.partial(jax.jit, static_argnames=("n_bins",))
def ece_loss(confs, accs, n_bins=20):
    """Pallas TPU implementation of ECELoss.forward. Returns shape (1,) f32."""
    confs = jnp.asarray(confs, jnp.float32).reshape(-1)
    accs = jnp.asarray(accs, jnp.float32).reshape(-1)
    n = int(confs.shape[0])
    if n == 0:
        return jnp.zeros((1,), jnp.float32)

    # Pad (zeros -> d = 0 contributes to no boundary sum) only to the next
    # multiple of 1024 so the flat array reshapes into (rows, 128) vreg rows.
    # When N is already a multiple of 1024 this is a free bitcast reshape: no
    # extra HBM pass.  We never pad to the block-row multiple.
    # TODO(synk): the remaining single pad copy (N % 1024 != 0) could be
    # removed with a manual ragged-tail DMA (memory_space=pl.ANY).
    padded = -(-n // _GROUP_ELEMS) * _GROUP_ELEMS
    if padded != n:
        confs = jnp.pad(confs, (0, padded - n))
        accs = jnp.pad(accs, (0, padded - n))
    rows = padded // _LANES
    confs2d = confs.reshape(rows, _LANES)
    accs2d = accs.reshape(rows, _LANES)

    # Aim for >= 2 grid steps so the "parallel" axis can be split across the
    # two TensorCores on v7x; cap block size for VMEM.
    target = -(-max(_SUBLANES, -(-rows // 2)) // _SUBLANES) * _SUBLANES
    block_rows = min(_MAX_BLOCK_ROWS, target)
    grid = -(-rows // block_rows)
    full_groups = block_rows // _SUBLANES
    tail_groups = (rows - (grid - 1) * block_rows) // _SUBLANES

    bounds = tuple(
        float(v) for v in np.linspace(0.5, 1.0, n_bins + 1, dtype=np.float32)
    )
    nb = n_bins + 1

    kernel = functools.partial(
        _ece_kernel, bounds=bounds,
        full_groups=full_groups, tail_groups=tail_groups)

    partials = pl.pallas_call(
        kernel,
        out_shape=jax.ShapeDtypeStruct((grid, nb, _SUBLANES, _LANES), jnp.float32),
        grid=(grid,),
        in_specs=[
            pl.BlockSpec((block_rows, _LANES), lambda i: (i, 0)),
            pl.BlockSpec((block_rows, _LANES), lambda i: (i, 0)),
        ],
        out_specs=pl.BlockSpec((1, nb, _SUBLANES, _LANES),
                               lambda i: (i, 0, 0, 0)),
        compiler_params=pltpu.CompilerParams(
            # Grid steps are fully independent -> megacore-splittable on v7x.
            dimension_semantics=("parallel",),
        ),
    )(confs2d, accs2d)

    # Tiny finalize outside the kernel: S_b -> sum_b |S_{b+1} - S_b| / N.
    s = jnp.sum(partials, axis=(0, 2, 3))                   # (n_bins + 1,)
    ece = jnp.sum(jnp.abs(s[1:] - s[:-1])) * jnp.float32(1.0 / n)
    return ece.reshape(1)


def _ece_reference(confs, accs, n_bins=20):
    """Pure-numpy reference mirroring the PyTorch loop exactly."""
    confs = np.asarray(confs, np.float32).reshape(-1)
    accs = np.asarray(accs, np.float32).reshape(-1)
    bounds = np.linspace(0.5, 1.0, n_bins + 1, dtype=np.float32)
    ece = np.zeros(1, np.float32)
    for lo, hi in zip(bounds[:-1], bounds[1:]):
        in_bin = (confs > lo) & (confs <= hi)
        prop = in_bin.astype(np.float32).mean()
        if prop > 0:
            acc_in = accs[in_bin].mean()
            conf_in = confs[in_bin].mean()
            ece += np.abs(conf_in - acc_in) * prop
    return ece


if __name__ == "__main__":
    key = jax.random.PRNGKey(0)

    # Two small sizes: n=1000 exercises the 1024-pad path (single full block);
    # n=5120 exercises the zero-copy path with a ragged last grid block.
    for n in (1000, 5120):
        k1, k2 = jax.random.split(jax.random.fold_in(key, n))
        confs = jax.random.uniform(k1, (n,), jnp.float32, minval=0.5, maxval=1.0)
        accs = (jax.random.uniform(k2, (n,), jnp.float32) < confs).astype(jnp.float32)

        ece = jax.block_until_ready(ece_loss(confs, accs, n_bins=20))
        ref = _ece_reference(np.asarray(confs), np.asarray(accs), n_bins=20)

        assert ece.shape == (1,)
        assert np.allclose(np.asarray(ece), ref, rtol=1e-4, atol=1e-5), (n, ece, ref)

    print("KERNEL_OK")
</pallas_src>

<mosaic_0001>
module attributes {stable_mosaic.version = 11 : i64} {
  func.func @_ece_kernel(%arg0: i32, %arg1: memref<8x128xf32, #tpu.memory_space<vmem>>, %arg2: memref<8x128xf32, #tpu.memory_space<vmem>>, %arg3: memref<1x21x8x128xf32, #tpu.memory_space<vmem>>) attributes {dimension_semantics = [#tpu.dimension_semantics<parallel>], iteration_bounds = array<i64: 1>, scalar_prefetch = 0 : i64, scratch_operands = 0 : i64, tpu.core_type = #tpu.core_type<tc>, window_params = [{transform_indices = @transform_0, window_bounds = array<i64: 8, 128>}, {transform_indices = @transform_1, window_bounds = array<i64: 8, 128>}, {transform_indices = @transform_2, window_bounds = array<i64: 1, 21, 8, 128>}]} {
    %cst = arith.constant 0.000000e+00 : f32
    %0 = vector.broadcast %cst : f32 to vector<8x128xf32>
    %cst_0 = arith.constant 0.000000e+00 : f32
    %1 = vector.broadcast %cst_0 : f32 to vector<8x128xf32>
    %cst_1 = arith.constant 0.000000e+00 : f32
    %2 = vector.broadcast %cst_1 : f32 to vector<8x128xf32>
    %cst_2 = arith.constant 0.000000e+00 : f32
    %3 = vector.broadcast %cst_2 : f32 to vector<8x128xf32>
    %cst_3 = arith.constant 0.000000e+00 : f32
    %4 = vector.broadcast %cst_3 : f32 to vector<8x128xf32>
    %cst_4 = arith.constant 0.000000e+00 : f32
    %5 = vector.broadcast %cst_4 : f32 to vector<8x128xf32>
    %cst_5 = arith.constant 0.000000e+00 : f32
    %6 = vector.broadcast %cst_5 : f32 to vector<8x128xf32>
    %cst_6 = arith.constant 0.000000e+00 : f32
    %7 = vector.broadcast %cst_6 : f32 to vector<8x128xf32>
    %cst_7 = arith.constant 0.000000e+00 : f32
    %8 = vector.broadcast %cst_7 : f32 to vector<8x128xf32>
    %cst_8 = arith.constant 0.000000e+00 : f32
    %9 = vector.broadcast %cst_8 : f32 to vector<8x128xf32>
    %cst_9 = arith.constant 0.000000e+00 : f32
    %10 = vector.broadcast %cst_9 : f32 to vector<8x128xf32>
    %cst_10 = arith.constant 0.000000e+00 : f32
    %11 = vector.broadcast %cst_10 : f32 to vector<8x128xf32>
    %cst_11 = arith.constant 0.000000e+00 : f32
    %12 = vector.broadcast %cst_11 : f32 to vector<8x128xf32>
    %cst_12 = arith.constant 0.000000e+00 : f32
    %13 = vector.broadcast %cst_12 : f32 to vector<8x128xf32>
    %cst_13 = arith.constant 0.000000e+00 : f32
    %14 = vector.broadcast %cst_13 : f32 to vector<8x128xf32>
    %cst_14 = arith.constant 0.000000e+00 : f32
    %15 = vector.broadcast %cst_14 : f32 to vector<8x128xf32>
    %cst_15 = arith.constant 0.000000e+00 : f32
    %16 = vector.broadcast %cst_15 : f32 to vector<8x128xf32>
    %cst_16 = arith.constant 0.000000e+00 : f32
    %17 = vector.broadcast %cst_16 : f32 to vector<8x128xf32>
    %cst_17 = arith.constant 0.000000e+00 : f32
    %18 = vector.broadcast %cst_17 : f32 to vector<8x128xf32>
    %cst_18 = arith.constant 0.000000e+00 : f32
    %19 = vector.broadcast %cst_18 : f32 to vector<8x128xf32>
    %cst_19 = arith.constant 0.000000e+00 : f32
    %20 = vector.broadcast %cst_19 : f32 to vector<8x128xf32>
    %c0_i32 = arith.constant 0 : i32
    %c8_i32 = arith.constant 8 : i32
    %21 = arith.muli %c0_i32, %c8_i32 : i32
    %22 = tpu.assume_multiple %21, 8 : i32
    %23 = arith.index_cast %22 : i32 to index
    %c0 = arith.constant 0 : index
    %24 = vector.load %arg1[%23, %c0] : memref<8x128xf32, #tpu.memory_space<vmem>>, vector<8x128xf32>
    %25 = arith.index_cast %22 : i32 to index
    %c0_20 = arith.constant 0 : index
    %26 = vector.load %arg2[%25, %c0_20] : memref<8x128xf32, #tpu.memory_space<vmem>>, vector<8x128xf32>
    %27 = arith.subf %24, %26 : vector<8x128xf32>
    %cst_21 = arith.constant 5.000000e-01 : f32
    %28 = vector.broadcast %cst_21 : f32 to vector<8x128xf32>
    %29 = arith.cmpf ole, %24, %28 : vector<8x128xf32>
    %cst_22 = arith.constant 0.000000e+00 : f32
    %30 = vector.broadcast %cst_22 : f32 to vector<8x128xf32>
    %31 = arith.select %29, %27, %30 : vector<8x128xi1>, vector<8x128xf32>
    %32 = arith.addf %0, %31 : vector<8x128xf32>
    %cst_23 = arith.constant 5.250000e-01 : f32
    %33 = vector.broadcast %cst_23 : f32 to vector<8x128xf32>
    %34 = arith.cmpf ole, %24, %33 : vector<8x128xf32>
    %cst_24 = arith.constant 0.000000e+00 : f32
    %35 = vector.broadcast %cst_24 : f32 to vector<8x128xf32>
    %36 = arith.select %34, %27, %35 : vector<8x128xi1>, vector<8x128xf32>
    %37 = arith.addf %1, %36 : vector<8x128xf32>
    %cst_25 = arith.constant 5.500000e-01 : f32
    %38 = vector.broadcast %cst_25 : f32 to vector<8x128xf32>
    %39 = arith.cmpf ole, %24, %38 : vector<8x128xf32>
    %cst_26 = arith.constant 0.000000e+00 : f32
    %40 = vector.broadcast %cst_26 : f32 to vector<8x128xf32>
    %41 = arith.select %39, %27, %40 : vector<8x128xi1>, vector<8x128xf32>
    %42 = arith.addf %2, %41 : vector<8x128xf32>
    %cst_27 = arith.constant 5.750000e-01 : f32
    %43 = vector.broadcast %cst_27 : f32 to vector<8x128xf32>
    %44 = arith.cmpf ole, %24, %43 : vector<8x128xf32>
    %cst_28 = arith.constant 0.000000e+00 : f32
    %45 = vector.broadcast %cst_28 : f32 to vector<8x128xf32>
    %46 = arith.select %44, %27, %45 : vector<8x128xi1>, vector<8x128xf32>
    %47 = arith.addf %3, %46 : vector<8x128xf32>
    %cst_29 = arith.constant 6.000000e-01 : f32
    %48 = vector.broadcast %cst_29 : f32 to vector<8x128xf32>
    %49 = arith.cmpf ole, %24, %48 : vector<8x128xf32>
    %cst_30 = arith.constant 0.000000e+00 : f32
    %50 = vector.broadcast %cst_30 : f32 to vector<8x128xf32>
    %51 = arith.select %49, %27, %50 : vector<8x128xi1>, vector<8x128xf32>
    %52 = arith.addf %4, %51 : vector<8x128xf32>
    %cst_31 = arith.constant 6.250000e-01 : f32
    %53 = vector.broadcast %cst_31 : f32 to vector<8x128xf32>
    %54 = arith.cmpf ole, %24, %53 : vector<8x128xf32>
    %cst_32 = arith.constant 0.000000e+00 : f32
    %55 = vector.broadcast %cst_32 : f32 to vector<8x128xf32>
    %56 = arith.select %54, %27, %55 : vector<8x128xi1>, vector<8x128xf32>
    %57 = arith.addf %5, %56 : vector<8x128xf32>
    %cst_33 = arith.constant 6.500000e-01 : f32
    %58 = vector.broadcast %cst_33 : f32 to vector<8x128xf32>
    %59 = arith.cmpf ole, %24, %58 : vector<8x128xf32>
    %cst_34 = arith.constant 0.000000e+00 : f32
    %60 = vector.broadcast %cst_34 : f32 to vector<8x128xf32>
    %61 = arith.select %59, %27, %60 : vector<8x128xi1>, vector<8x128xf32>
    %62 = arith.addf %6, %61 : vector<8x128xf32>
    %cst_35 = arith.constant 6.750000e-01 : f32
    %63 = vector.broadcast %cst_35 : f32 to vector<8x128xf32>
    %64 = arith.cmpf ole, %24, %63 : vector<8x128xf32>
    %cst_36 = arith.constant 0.000000e+00 : f32
    %65 = vector.broadcast %cst_36 : f32 to vector<8x128xf32>
    %66 = arith.select %64, %27, %65 : vector<8x128xi1>, vector<8x128xf32>
    %67 = arith.addf %7, %66 : vector<8x128xf32>
    %cst_37 = arith.constant 0.699999988 : f32
    %68 = vector.broadcast %cst_37 : f32 to vector<8x128xf32>
    %69 = arith.cmpf ole, %24, %68 : vector<8x128xf32>
    %cst_38 = arith.constant 0.000000e+00 : f32
    %70 = vector.broadcast %cst_38 : f32 to vector<8x128xf32>
    %71 = arith.select %69, %27, %70 : vector<8x128xi1>, vector<8x128xf32>
    %72 = arith.addf %8, %71 : vector<8x128xf32>
    %cst_39 = arith.constant 7.250000e-01 : f32
    %73 = vector.broadcast %cst_39 : f32 to vector<8x128xf32>
    %74 = arith.cmpf ole, %24, %73 : vector<8x128xf32>
    %cst_40 = arith.constant 0.000000e+00 : f32
    %75 = vector.broadcast %cst_40 : f32 to vector<8x128xf32>
    %76 = arith.select %74, %27, %75 : vector<8x128xi1>, vector<8x128xf32>
    %77 = arith.addf %9, %76 : vector<8x128xf32>
    %cst_41 = arith.constant 7.500000e-01 : f32
    %78 = vector.broadcast %cst_41 : f32 to vector<8x128xf32>
    %79 = arith.cmpf ole, %24, %78 : vector<8x128xf32>
    %cst_42 = arith.constant 0.000000e+00 : f32
    %80 = vector.broadcast %cst_42 : f32 to vector<8x128xf32>
    %81 = arith.select %79, %27, %80 : vector<8x128xi1>, vector<8x128xf32>
    %82 = arith.addf %10, %81 : vector<8x128xf32>
    %cst_43 = arith.constant 0.774999976 : f32
    %83 = vector.broadcast %cst_43 : f32 to vector<8x128xf32>
    %84 = arith.cmpf ole, %24, %83 : vector<8x128xf32>
    %cst_44 = arith.constant 0.000000e+00 : f32
    %85 = vector.broadcast %cst_44 : f32 to vector<8x128xf32>
    %86 = arith.select %84, %27, %85 : vector<8x128xi1>, vector<8x128xf32>
    %87 = arith.addf %11, %86 : vector<8x128xf32>
    %cst_45 = arith.constant 8.000000e-01 : f32
    %88 = vector.broadcast %cst_45 : f32 to vector<8x128xf32>
    %89 = arith.cmpf ole, %24, %88 : vector<8x128xf32>
    %cst_46 = arith.constant 0.000000e+00 : f32
    %90 = vector.broadcast %cst_46 : f32 to vector<8x128xf32>
    %91 = arith.select %89, %27, %90 : vector<8x128xi1>, vector<8x128xf32>
    %92 = arith.addf %12, %91 : vector<8x128xf32>
    %cst_47 = arith.constant 0.824999988 : f32
    %93 = vector.broadcast %cst_47 : f32 to vector<8x128xf32>
    %94 = arith.cmpf ole, %24, %93 : vector<8x128xf32>
    %cst_48 = arith.constant 0.000000e+00 : f32
    %95 = vector.broadcast %cst_48 : f32 to vector<8x128xf32>
    %96 = arith.select %94, %27, %95 : vector<8x128xi1>, vector<8x128xf32>
    %97 = arith.addf %13, %96 : vector<8x128xf32>
    %cst_49 = arith.constant 8.500000e-01 : f32
    %98 = vector.broadcast %cst_49 : f32 to vector<8x128xf32>
    %99 = arith.cmpf ole, %24, %98 : vector<8x128xf32>
    %cst_50 = arith.constant 0.000000e+00 : f32
    %100 = vector.broadcast %cst_50 : f32 to vector<8x128xf32>
    %101 = arith.select %99, %27, %100 : vector<8x128xi1>, vector<8x128xf32>
    %102 = arith.addf %14, %101 : vector<8x128xf32>
    %cst_51 = arith.constant 8.750000e-01 : f32
    %103 = vector.broadcast %cst_51 : f32 to vector<8x128xf32>
    %104 = arith.cmpf ole, %24, %103 : vector<8x128xf32>
    %cst_52 = arith.constant 0.000000e+00 : f32
    %105 = vector.broadcast %cst_52 : f32 to vector<8x128xf32>
    %106 = arith.select %104, %27, %105 : vector<8x128xi1>, vector<8x128xf32>
    %107 = arith.addf %15, %106 : vector<8x128xf32>
    %cst_53 = arith.constant 0.899999976 : f32
    %108 = vector.broadcast %cst_53 : f32 to vector<8x128xf32>
    %109 = arith.cmpf ole, %24, %108 : vector<8x128xf32>
    %cst_54 = arith.constant 0.000000e+00 : f32
    %110 = vector.broadcast %cst_54 : f32 to vector<8x128xf32>
    %111 = arith.select %109, %27, %110 : vector<8x128xi1>, vector<8x128xf32>
    %112 = arith.addf %16, %111 : vector<8x128xf32>
    %cst_55 = arith.constant 9.250000e-01 : f32
    %113 = vector.broadcast %cst_55 : f32 to vector<8x128xf32>
    %114 = arith.cmpf ole, %24, %113 : vector<8x128xf32>
    %cst_56 = arith.constant 0.000000e+00 : f32
    %115 = vector.broadcast %cst_56 : f32 to vector<8x128xf32>
    %116 = arith.select %114, %27, %115 : vector<8x128xi1>, vector<8x128xf32>
    %117 = arith.addf %17, %116 : vector<8x128xf32>
    %cst_57 = arith.constant 0.949999988 : f32
    %118 = vector.broadcast %cst_57 : f32 to vector<8x128xf32>
    %119 = arith.cmpf ole, %24, %118 : vector<8x128xf32>
    %cst_58 = arith.constant 0.000000e+00 : f32
    %120 = vector.broadcast %cst_58 : f32 to vector<8x128xf32>
    %121 = arith.select %119, %27, %120 : vector<8x128xi1>, vector<8x128xf32>
    %122 = arith.addf %18, %121 : vector<8x128xf32>
    %cst_59 = arith.constant 9.750000e-01 : f32
    %123 = vector.broadcast %cst_59 : f32 to vector<8x128xf32>
    %124 = arith.cmpf ole, %24, %123 : vector<8x128xf32>
    %cst_60 = arith.constant 0.000000e+00 : f32
    %125 = vector.broadcast %cst_60 : f32 to vector<8x128xf32>
    %126 = arith.select %124, %27, %125 : vector<8x128xi1>, vector<8x128xf32>
    %127 = arith.addf %19, %126 : vector<8x128xf32>
    %cst_61 = arith.constant 1.000000e+00 : f32
    %128 = vector.broadcast %cst_61 : f32 to vector<8x128xf32>
    %129 = arith.cmpf ole, %24, %128 : vector<8x128xf32>
    %cst_62 = arith.constant 0.000000e+00 : f32
    %130 = vector.broadcast %cst_62 : f32 to vector<8x128xf32>
    %131 = arith.select %129, %27, %130 : vector<8x128xi1>, vector<8x128xf32>
    %132 = arith.addf %20, %131 : vector<8x128xf32>
    %c1_i32 = arith.constant 1 : i32
    %c0_63 = arith.constant 0 : index
    %c0_64 = arith.constant 0 : index
    %c0_65 = arith.constant 0 : index
    %c0_66 = arith.constant 0 : index
    %133 = vector.load %arg3[%c0_63, %c0_64, %c0_65, %c0_66] : memref<1x21x8x128xf32, #tpu.memory_space<vmem>>, vector<1x1x8x128xf32>
    %134 = vector.shape_cast %133 : vector<1x1x8x128xf32> to vector<8x128xf32>
    %135 = vector.shape_cast %32 : vector<8x128xf32> to vector<1x1x8x128xf32>
    tpu.vector_store %arg3[%c0_63, %c0_64, %c0_65, %c0_66], %135 {strides = array<i32>} : memref<1x21x8x128xf32, #tpu.memory_space<vmem>>, vector<1x1x8x128xf32>,
    %c0_67 = arith.constant 0 : index
    %c1 = arith.constant 1 : index
    %c0_68 = arith.constant 0 : index
    %c0_69 = arith.constant 0 : index
    %136 = vector.load %arg3[%c0_67, %c1, %c0_68, %c0_69] : memref<1x21x8x128xf32, #tpu.memory_space<vmem>>, vector<1x1x8x128xf32>
    %137 = vector.shape_cast %136 : vector<1x1x8x128xf32> to vector<8x128xf32>
    %138 = vector.shape_cast %37 : vector<8x128xf32> to vector<1x1x8x128xf32>
    tpu.vector_store %arg3[%c0_67, %c1, %c0_68, %c0_69], %138 {strides = array<i32>} : memref<1x21x8x128xf32, #tpu.memory_space<vmem>>, vector<1x1x8x128xf32>,
    %c0_70 = arith.constant 0 : index
    %c2 = arith.constant 2 : index
    %c0_71 = arith.constant 0 : index
    %c0_72 = arith.constant 0 : index
    %139 = vector.load %arg3[%c0_70, %c2, %c0_71, %c0_72] : memref<1x21x8x128xf32, #tpu.memory_space<vmem>>, vector<1x1x8x128xf32>
    %140 = vector.shape_cast %139 : vector<1x1x8x128xf32> to vector<8x128xf32>
    %141 = vector.shape_cast %42 : vector<8x128xf32> to vector<1x1x8x128xf32>
    tpu.vector_store %arg3[%c0_70, %c2, %c0_71, %c0_72], %141 {strides = array<i32>} : memref<1x21x8x128xf32, #tpu.memory_space<vmem>>, vector<1x1x8x128xf32>,
    %c0_73 = arith.constant 0 : index
    %c3 = arith.constant 3 : index
    %c0_74 = arith.constant 0 : index
    %c0_75 = arith.constant 0 : index
    %142 = vector.load %arg3[%c0_73, %c3, %c0_74, %c0_75] : memref<1x21x8x128xf32, #tpu.memory_space<vmem>>, vector<1x1x8x128xf32>
    %143 = vector.shape_cast %142 : vector<1x1x8x128xf32> to vector<8x128xf32>
    %144 = vector.shape_cast %47 : vector<8x128xf32> to vector<1x1x8x128xf32>
    tpu.vector_store %arg3[%c0_73, %c3, %c0_74, %c0_75], %144 {strides = array<i32>} : memref<1x21x8x128xf32, #tpu.memory_space<vmem>>, vector<1x1x8x128xf32>,
    %c0_76 = arith.constant 0 : index
    %c4 = arith.constant 4 : index
    %c0_77 = arith.constant 0 : index
    %c0_78 = arith.constant 0 : index
    %145 = vector.load %arg3[%c0_76, %c4, %c0_77, %c0_78] : memref<1x21x8x128xf32, #tpu.memory_space<vmem>>, vector<1x1x8x128xf32>
    %146 = vector.shape_cast %145 : vector<1x1x8x128xf32> to vector<8x128xf32>
    %147 = vector.shape_cast %52 : vector<8x128xf32> to vector<1x1x8x128xf32>
    tpu.vector_store %arg3[%c0_76, %c4, %c0_77, %c0_78], %147 {strides = array<i32>} : memref<1x21x8x128xf32, #tpu.memory_space<vmem>>, vector<1x1x8x128xf32>,
    %c0_79 = arith.constant 0 : index
    %c5 = arith.constant 5 : index
    %c0_80 = arith.constant 0 : index
    %c0_81 = arith.constant 0 : index
    %148 = vector.load %arg3[%c0_79, %c5, %c0_80, %c0_81] : memref<1x21x8x128xf32, #tpu.memory_space<vmem>>, vector<1x1x8x128xf32>
    %149 = vector.shape_cast %148 : vector<1x1x8x128xf32> to vector<8x128xf32>
    %150 = vector.shape_cast %57 : vector<8x128xf32> to vector<1x1x8x128xf32>
    tpu.vector_store %arg3[%c0_79, %c5, %c0_80, %c0_81], %150 {strides = array<i32>} : memref<1x21x8x128xf32, #tpu.memory_space<vmem>>, vector<1x1x8x128xf32>,
    %c0_82 = arith.constant 0 : index
    %c6 = arith.constant 6 : index
    %c0_83 = arith.constant 0 : index
    %c0_84 = arith.constant 0 : index
    %151 = vector.load %arg3[%c0_82, %c6, %c0_83, %c0_84] : memref<1x21x8x128xf32, #tpu.memory_space<vmem>>, vector<1x1x8x128xf32>
    %152 = vector.shape_cast %151 : vector<1x1x8x128xf32> to vector<8x128xf32>
    %153 = vector.shape_cast %62 : vector<8x128xf32> to vector<1x1x8x128xf32>
    tpu.vector_store %arg3[%c0_82, %c6, %c0_83, %c0_84], %153 {strides = array<i32>} : memref<1x21x8x128xf32, #tpu.memory_space<vmem>>, vector<1x1x8x128xf32>,
    %c0_85 = arith.constant 0 : index
    %c7 = arith.constant 7 : index
    %c0_86 = arith.constant 0 : index
    %c0_87 = arith.constant 0 : index
    %154 = vector.load %arg3[%c0_85, %c7, %c0_86, %c0_87] : memref<1x21x8x128xf32, #tpu.memory_space<vmem>>, vector<1x1x8x128xf32>
    %155 = vector.shape_cast %154 : vector<1x1x8x128xf32> to vector<8x128xf32>
    %156 = vector.shape_cast %67 : vector<8x128xf32> to vector<1x1x8x128xf32>
    tpu.vector_store %arg3[%c0_85, %c7, %c0_86, %c0_87], %156 {strides = array<i32>} : memref<1x21x8x128xf32, #tpu.memory_space<vmem>>, vector<1x1x8x128xf32>,
    %c0_88 = arith.constant 0 : index
    %c8 = arith.constant 8 : index
    %c0_89 = arith.constant 0 : index
    %c0_90 = arith.constant 0 : index
    %157 = vector.load %arg3[%c0_88, %c8, %c0_89, %c0_90] : memref<1x21x8x128xf32, #tpu.memory_space<vmem>>, vector<1x1x8x128xf32>
    %158 = vector.shape_cast %157 : vector<1x1x8x128xf32> to vector<8x128xf32>
    %159 = vector.shape_cast %72 : vector<8x128xf32> to vector<1x1x8x128xf32>
    tpu.vector_store %arg3[%c0_88, %c8, %c0_89, %c0_90], %159 {strides = array<i32>} : memref<1x21x8x128xf32, #tpu.memory_space<vmem>>, vector<1x1x8x128xf32>,
    %c0_91 = arith.constant 0 : index
    %c9 = arith.constant 9 : index
    %c0_92 = arith.constant 0 : index
    %c0_93 = arith.constant 0 : index
    %160 = vector.load %arg3[%c0_91, %c9, %c0_92, %c0_93] : memref<1x21x8x128xf32, #tpu.memory_space<vmem>>, vector<1x1x8x128xf32>
    %161 = vector.shape_cast %160 : vector<1x1x8x128xf32> to vector<8x128xf32>
    %162 = vector.shape_cast %77 : vector<8x128xf32> to vector<1x1x8x128xf32>
    tpu.vector_store %arg3[%c0_91, %c9, %c0_92, %c0_93], %162 {strides = array<i32>} : memref<1x21x8x128xf32, #tpu.memory_space<vmem>>, vector<1x1x8x128xf32>,
    %c0_94 = arith.constant 0 : index
    %c10 = arith.constant 10 : index
    %c0_95 = arith.constant 0 : index
    %c0_96 = arith.constant 0 : index
    %163 = vector.load %arg3[%c0_94, %c10, %c0_95, %c0_96] : memref<1x21x8x128xf32, #tpu.memory_space<vmem>>, vector<1x1x8x128xf32>
    %164 = vector.shape_cast %163 : vector<1x1x8x128xf32> to vector<8x128xf32>
    %165 = vector.shape_cast %82 : vector<8x128xf32> to vector<1x1x8x128xf32>
    tpu.vector_store %arg3[%c0_94, %c10, %c0_95, %c0_96], %165 {strides = array<i32>} : memref<1x21x8x128xf32, #tpu.memory_space<vmem>>, vector<1x1x8x128xf32>,
    %c0_97 = arith.constant 0 : index
    %c11 = arith.constant 11 : index
    %c0_98 = arith.constant 0 : index
    %c0_99 = arith.constant 0 : index
    %166 = vector.load %arg3[%c0_97, %c11, %c0_98, %c0_99] : memref<1x21x8x128xf32, #tpu.memory_space<vmem>>, vector<1x1x8x128xf32>
    %167 = vector.shape_cast %166 : vector<1x1x8x128xf32> to vector<8x128xf32>
    %168 = vector.shape_cast %87 : vector<8x128xf32> to vector<1x1x8x128xf32>
    tpu.vector_store %arg3[%c0_97, %c11, %c0_98, %c0_99], %168 {strides = array<i32>} : memref<1x21x8x128xf32, #tpu.memory_space<vmem>>, vector<1x1x8x128xf32>,
    %c0_100 = arith.constant 0 : index
    %c12 = arith.constant 12 : index
    %c0_101 = arith.constant 0 : index
    %c0_102 = arith.constant 0 : index
    %169 = vector.load %arg3[%c0_100, %c12, %c0_101, %c0_102] : memref<1x21x8x128xf32, #tpu.memory_space<vmem>>, vector<1x1x8x128xf32>
    %170 = vector.shape_cast %169 : vector<1x1x8x128xf32> to vector<8x128xf32>
    %171 = vector.shape_cast %92 : vector<8x128xf32> to vector<1x1x8x128xf32>
    tpu.vector_store %arg3[%c0_100, %c12, %c0_101, %c0_102], %171 {strides = array<i32>} : memref<1x21x8x128xf32, #tpu.memory_space<vmem>>, vector<1x1x8x128xf32>,
    %c0_103 = arith.constant 0 : index
    %c13 = arith.constant 13 : index
    %c0_104 = arith.constant 0 : index
    %c0_105 = arith.constant 0 : index
    %172 = vector.load %arg3[%c0_103, %c13, %c0_104, %c0_105] : memref<1x21x8x128xf32, #tpu.memory_space<vmem>>, vector<1x1x8x128xf32>
    %173 = vector.shape_cast %172 : vector<1x1x8x128xf32> to vector<8x128xf32>
    %174 = vector.shape_cast %97 : vector<8x128xf32> to vector<1x1x8x128xf32>
    tpu.vector_store %arg3[%c0_103, %c13, %c0_104, %c0_105], %174 {strides = array<i32>} : memref<1x21x8x128xf32, #tpu.memory_space<vmem>>, vector<1x1x8x128xf32>,
    %c0_106 = arith.constant 0 : index
    %c14 = arith.constant 14 : index
    %c0_107 = arith.constant 0 : index
    %c0_108 = arith.constant 0 : index
    %175 = vector.load %arg3[%c0_106, %c14, %c0_107, %c0_108] : memref<1x21x8x128xf32, #tpu.memory_space<vmem>>, vector<1x1x8x128xf32>
    %176 = vector.shape_cast %175 : vector<1x1x8x128xf32> to vector<8x128xf32>
    %177 = vector.shape_cast %102 : vector<8x128xf32> to vector<1x1x8x128xf32>
    tpu.vector_store %arg3[%c0_106, %c14, %c0_107, %c0_108], %177 {strides = array<i32>} : memref<1x21x8x128xf32, #tpu.memory_space<vmem>>, vector<1x1x8x128xf32>,
    %c0_109 = arith.constant 0 : index
    %c15 = arith.constant 15 : index
    %c0_110 = arith.constant 0 : index
    %c0_111 = arith.constant 0 : index
    %178 = vector.load %arg3[%c0_109, %c15, %c0_110, %c0_111] : memref<1x21x8x128xf32, #tpu.memory_space<vmem>>, vector<1x1x8x128xf32>
    %179 = vector.shape_cast %178 : vector<1x1x8x128xf32> to vector<8x128xf32>
    %180 = vector.shape_cast %107 : vector<8x128xf32> to vector<1x1x8x128xf32>
    tpu.vector_store %arg3[%c0_109, %c15, %c0_110, %c0_111], %180 {strides = array<i32>} : memref<1x21x8x128xf32, #tpu.memory_space<vmem>>, vector<1x1x8x128xf32>,
    %c0_112 = arith.constant 0 : index
    %c16 = arith.constant 16 : index
    %c0_113 = arith.constant 0 : index
    %c0_114 = arith.constant 0 : index
    %181 = vector.load %arg3[%c0_112, %c16, %c0_113, %c0_114] : memref<1x21x8x128xf32, #tpu.memory_space<vmem>>, vector<1x1x8x128xf32>
    %182 = vector.shape_cast %181 : vector<1x1x8x128xf32> to vector<8x128xf32>
    %183 = vector.shape_cast %112 : vector<8x128xf32> to vector<1x1x8x128xf32>
    tpu.vector_store %arg3[%c0_112, %c16, %c0_113, %c0_114], %183 {strides = array<i32>} : memref<1x21x8x128xf32, #tpu.memory_space<vmem>>, vector<1x1x8x128xf32>,
    %c0_115 = arith.constant 0 : index
    %c17 = arith.constant 17 : index
    %c0_116 = arith.constant 0 : index
    %c0_117 = arith.constant 0 : index
    %184 = vector.load %arg3[%c0_115, %c17, %c0_116, %c0_117] : memref<1x21x8x128xf32, #tpu.memory_space<vmem>>, vector<1x1x8x128xf32>
    %185 = vector.shape_cast %184 : vector<1x1x8x128xf32> to vector<8x128xf32>
    %186 = vector.shape_cast %117 : vector<8x128xf32> to vector<1x1x8x128xf32>
    tpu.vector_store %arg3[%c0_115, %c17, %c0_116, %c0_117], %186 {strides = array<i32>} : memref<1x21x8x128xf32, #tpu.memory_space<vmem>>, vector<1x1x8x128xf32>,
    %c0_118 = arith.constant 0 : index
    %c18 = arith.constant 18 : index
    %c0_119 = arith.constant 0 : index
    %c0_120 = arith.constant 0 : index
    %187 = vector.load %arg3[%c0_118, %c18, %c0_119, %c0_120] : memref<1x21x8x128xf32, #tpu.memory_space<vmem>>, vector<1x1x8x128xf32>
    %188 = vector.shape_cast %187 : vector<1x1x8x128xf32> to vector<8x128xf32>
    %189 = vector.shape_cast %122 : vector<8x128xf32> to vector<1x1x8x128xf32>
    tpu.vector_store %arg3[%c0_118, %c18, %c0_119, %c0_120], %189 {strides = array<i32>} : memref<1x21x8x128xf32, #tpu.memory_space<vmem>>, vector<1x1x8x128xf32>,
    %c0_121 = arith.constant 0 : index
    %c19 = arith.constant 19 : index
    %c0_122 = arith.constant 0 : index
    %c0_123 = arith.constant 0 : index
    %190 = vector.load %arg3[%c0_121, %c19, %c0_122, %c0_123] : memref<1x21x8x128xf32, #tpu.memory_space<vmem>>, vector<1x1x8x128xf32>
    %191 = vector.shape_cast %190 : vector<1x1x8x128xf32> to vector<8x128xf32>
    %192 = vector.shape_cast %127 : vector<8x128xf32> to vector<1x1x8x128xf32>
    tpu.vector_store %arg3[%c0_121, %c19, %c0_122, %c0_123], %192 {strides = array<i32>} : memref<1x21x8x128xf32, #tpu.memory_space<vmem>>, vector<1x1x8x128xf32>,
    %c0_124 = arith.constant 0 : index
    %c20 = arith.constant 20 : index
    %c0_125 = arith.constant 0 : index
    %c0_126 = arith.constant 0 : index
    %193 = vector.load %arg3[%c0_124, %c20, %c0_125, %c0_126] : memref<1x21x8x128xf32, #tpu.memory_space<vmem>>, vector<1x1x8x128xf32>
    %194 = vector.shape_cast %193 : vector<1x1x8x128xf32> to vector<8x128xf32>
    %195 = vector.shape_cast %132 : vector<8x128xf32> to vector<1x1x8x128xf32>
    tpu.vector_store %arg3[%c0_124, %c20, %c0_125, %c0_126], %195 {strides = array<i32>} : memref<1x21x8x128xf32, #tpu.memory_space<vmem>>, vector<1x1x8x128xf32>,
    return
  }
  func.func @transform_0(%arg0: i32) -> (i32, i32) {
    %c0_i32 = arith.constant 0 : i32
    %c0_i32_0 = arith.constant 0 : i32
    return %arg0, %c0_i32 : i32, i32
  }
  func.func @transform_1(%arg0: i32) -> (i32, i32) {
    %c0_i32 = arith.constant 0 : i32
    %c0_i32_0 = arith.constant 0 : i32
    return %arg0, %c0_i32 : i32, i32
  }
  func.func @transform_2(%arg0: i32) -> (i32, i32, i32, i32) {
    %c0_i32 = arith.constant 0 : i32
    %c0_i32_0 = arith.constant 0 : i32
    %c0_i32_1 = arith.constant 0 : i32
    %c0_i32_2 = arith.constant 0 : i32
    return %arg0, %c0_i32, %c0_i32_0, %c0_i32_1 : i32, i32, i32, i32
  }
}

</mosaic_0001>

<bundles_post_ra>
// kernel: ece_loss.1
= control target key start
LH: loop header
LB: loop body
LE: loop exit
PB: predicated region body
PF: predicated region fallthrough
CT: control target
= control target key end

     0   :  { %s252_s0 = inlined_call_operand.vmem [shape: f32[8,128], index: 0, kind: input, shape index: {}]   ;;  %s253_s1 = inlined_call_operand.vmem [shape: f32[8,128], index: 1, kind: input, shape index: {}]   ;;  %s254_s2 = inlined_call_operand.vmem [shape: f32[1,21,8,128], index: 2, kind: output, shape index: {}]  }
   0x1   :  { %v160_v0 = vld [vmem:[%s252_s0] sm:$0xff] }
   0x2   :  { %v12_v1 = vld [vmem:[%s253_s1] sm:$0xff]  ;;  %vm14_vm0 = vcmp.le.f32.partialorder %v160_v0, 0.5  ;;  %vm17_vm1 = vcmp.le.f32.partialorder %v160_v0, 0.525  ;;  %vm20_vm2 = vcmp.le.f32.partialorder %v160_v0, 0.55 }
   0x3   :  { %v13_v2 = vsub.f32 %v160_v0, %v12_v1  ;;  %vm23_vm3 = vcmp.le.f32.partialorder %v160_v0, 0.575  ;;  %vm26_vm4 = vcmp.le.f32.partialorder %v160_v0, 0.6  ;;  %vm29_vm5 = vcmp.le.f32.partialorder %v160_v0, 0.625 }
   0x4   :  { %vm44_vm6 = vcmp.le.f32.partialorder %v160_v0, 0.75  ;;  %vm32_vm7 = vcmp.le.f32.partialorder %v160_v0, 0.65  ;;  %vm35_vm8 = vcmp.le.f32.partialorder %v160_v0, 0.675  ;;  %vm59_vm14 = vcmp.le.f32.partialorder %v160_v0, 0.875 }
   0x5   :  { %v15_v3 = vsel %vm14_vm0, %v13_v2, 0.0  ;;  %v18_v4 = vsel %vm17_vm1, %v13_v2, 0.0  ;;  %v21_v5 = vsel %vm20_vm2, %v13_v2, 0.0  ;;  %v24_v6 = vsel %vm23_vm3, %v13_v2, 0.0 }
   0x6   :  { %77 = vst [vmem:[%s254_s2] sm:$0xff] %v15_v3  ;;  %122 = vst [vmem:[%s254_s2 + $0x8] sm:$0xff] %v18_v4  ;;  %v27_v7 = vsel %vm26_vm4, %v13_v2, 0.0  ;;  %v30_v8 = vsel %vm29_vm5, %v13_v2, 0.0  ;;  %v33_v9 = vsel %vm32_vm7, %v13_v2, 0.0  ;;  %v36_v10 = vsel %vm35_vm8, %v13_v2, 0.0 }
   0x7   :  { %123 = vst [vmem:[%s254_s2 + $0x10] sm:$0xff] %v21_v5  ;;  %124 = vst [vmem:[%s254_s2 + $0x18] sm:$0xff] %v24_v6  ;;  %vm38_vm9 = vcmp.le.f32.partialorder %v160_v0, 0.7  ;;  %vm41_vm10 = vcmp.le.f32.partialorder %v160_v0, 0.725 }
   0x8   :  { %125 = vst [vmem:[%s254_s2 + $0x20] sm:$0xff] %v27_v7  ;;  %126 = vst [vmem:[%s254_s2 + $0x28] sm:$0xff] %v30_v8  ;;  %v39_v11 = vsel %vm38_vm9, %v13_v2, 0.0  ;;  %v42_v12 = vsel %vm41_vm10, %v13_v2, 0.0  ;;  %v45_v13 = vsel %vm44_vm6, %v13_v2, 0.0  ;;  %v60_v17 = vsel %vm59_vm14, %v13_v2, 0.0 }
   0x9   :  { %127 = vst [vmem:[%s254_s2 + $0x30] sm:$0xff] %v33_v9  ;;  %128 = vst [vmem:[%s254_s2 + $0x38] sm:$0xff] %v36_v10  ;;  %vm47_vm11 = vcmp.le.f32.partialorder %v160_v0, 0.775  ;;  %vm50_vm12 = vcmp.le.f32.partialorder %v160_v0, 0.8 }
   0xa   :  { %129 = vst [vmem:[%s254_s2 + $0x40] sm:$0xff] %v39_v11  ;;  %130 = vst [vmem:[%s254_s2 + $0x48] sm:$0xff] %v42_v12  ;;  %v48_v14 = vsel %vm47_vm11, %v13_v2, 0.0  ;;  %vm53_vm13 = vcmp.le.f32.partialorder %v160_v0, 0.825  ;;  %v51_v15 = vsel %vm50_vm12, %v13_v2, 0.0 }
   0xb   :  { %131 = vst [vmem:[%s254_s2 + $0x50] sm:$0xff] %v45_v13  ;;  %132 = vst [vmem:[%s254_s2 + $0x58] sm:$0xff] %v48_v14  ;;  %v54_v16 = vsel %vm53_vm13, %v13_v2, 0.0  ;;  %vm56_vm15 = vcmp.le.f32.partialorder %v160_v0, 0.85  ;;  %vm74_vm2 = vcmp.le.f32.partialorder %v160_v0, 1.0 }
   0xc   :  { %133 = vst [vmem:[%s254_s2 + $0x60] sm:$0xff] %v51_v15  ;;  %134 = vst [vmem:[%s254_s2 + $0x68] sm:$0xff] %v54_v16  ;;  %v57_v18 = vsel %vm56_vm15, %v13_v2, 0.0  ;;  %vm62_vm0 = vcmp.le.f32.partialorder %v160_v0, 0.9  ;;  %v75_v23 = vsel %vm74_vm2, %v13_v2, 0.0 }
   0xd   :  { %136 = vst [vmem:[%s254_s2 + $0x78] sm:$0xff] %v60_v17  ;;  %vm65_vm1 = vcmp.le.f32.partialorder %v160_v0, 0.925  ;;  %135 = vst [vmem:[%s254_s2 + $0x70] sm:$0xff] %v57_v18  ;;  %v63_v19 = vsel %vm62_vm0, %v13_v2, 0.0 }
   0xe   :  { %v66_v20 = vsel %vm65_vm1, %v13_v2, 0.0  ;;  %vm68_vm3 = vcmp.le.f32.partialorder %v160_v0, 0.95  ;;  %vm71_vm4 = vcmp.le.f32.partialorder %v160_v0, 0.975  ;;  %137 = vst [vmem:[%s254_s2 + $0x80] sm:$0xff] %v63_v19 }
   0xf   :  { %138 = vst [vmem:[%s254_s2 + $0x88] sm:$0xff] %v66_v20  ;;  %v69_v21 = vsel %vm68_vm3, %v13_v2, 0.0  ;;  %v72_v22 = vsel %vm71_vm4, %v13_v2, 0.0  ;;  %141 = vst [vmem:[%s254_s2 + $0xa0] sm:$0xff] %v75_v23 }
  0x10   :  { %139 = vst [vmem:[%s254_s2 + $0x90] sm:$0xff] %v69_v21  ;;  %140 = vst [vmem:[%s254_s2 + $0x98] sm:$0xff] %v72_v22 }

</bundles_post_ra>
